<compile_context>
chip_gen: v5e
topology: v5e:2x2
jax: 0.10.0
libtpu: 0.0.40
codegen_flags: <defaults>
</compile_context>

<pallas_src>
import jax
import jax.numpy as jnp
from jax import lax
from jax.experimental import pallas as pl
from jax.experimental.pallas import tpu as pltpu

EPS = 1e-5  # nn.InstanceNorm2d default

# ~4 MiB input block: read+write of a block is ~2.5 us even on v7x HBM, so the
# per-grid-step overhead (~0.35 us) is well amortized on every generation.
_TARGET_BLOCK_BYTES = 4 * 1024 * 1024
# Double-buffered (in + out) 4 MiB blocks = 16 MiB + f32 body temporaries;
# 48 MiB clears v5e's 16 MiB scoped default and stays under v7x's 64 MiB
# physical VMEM with headroom.
_VMEM_LIMIT_BYTES = 48 * 1024 * 1024
# Prefer >= this many grid steps (when the row count permits) so
# dimension_semantics=("parallel",) can shard across v7x's two TensorCores.
_MIN_GRID_STEPS = 4


def adain_kernel(gb_ref, x_ref, o_ref):
    # gb_ref: (TR, 2) float32 -- column 0 = gamma, column 1 = beta (per row).
    # x_ref / o_ref: (TR, HW) -- each row is one full (sample, channel) instance.
    x = x_ref[...].astype(jnp.float32)                         # one bulk upcast
    mean = jnp.mean(x, axis=-1, keepdims=True)                 # (TR, 1)
    var = jnp.mean((x - mean) ** 2, axis=-1, keepdims=True)    # biased variance
    gamma = gb_ref[:, 0:1].astype(jnp.float32)                 # (TR, 1)
    beta = gb_ref[:, 1:2].astype(jnp.float32)                  # (TR, 1)
    # Fused affine: out = gamma * (x - mean) * rsqrt(var + eps) + beta
    scale = gamma * lax.rsqrt(var + EPS)                       # (TR, 1)
    shift = beta - mean * scale                                # (TR, 1)
    o_ref[...] = (x * scale + shift).astype(o_ref.dtype)       # one bulk store


def _pick_block_rows(total_rows, row_bytes):
    """Block row count: a multiple-of-8 divisor of total_rows within budget.

    Also capped so the grid has >= _MIN_GRID_STEPS steps when total_rows is
    large enough (keeps both v7x TensorCores busy).  Falls back to the full
    row extent (always a legal block shape) for tiny / awkward row counts.
    """
    cap = max(1, _TARGET_BLOCK_BYTES // max(row_bytes, 1))
    cap = min(cap, max(8, total_rows // _MIN_GRID_STEPS))
    best = None
    for tr in range(8, total_rows + 1, 8):
        if tr > cap:
            break
        if total_rows % tr == 0:
            best = tr
    if best is None:
        # total_rows < 8, or no multiple-of-8 divisor fits the budget: take the
        # whole row axis (block dim == full array dim is always legal).
        # TODO(synk): if a single row block (total_rows * HW) ever exceeds the
        # VMEM budget (huge H*W on v7x's 64 MiB VMEM), add a second
        # "arbitrary" grid axis over HW with streaming sum/sumsq stats and a
        # pl.when finalize instead of holding the full rows.
        best = total_rows
    return best


def adaptive_instance_norm(x, style, weight_t, bias):
    """x: (N, C, H, W), style: (N, S), weight_t: (S, 2C), bias: (2C,)"""
    N, C, H, W = x.shape
    HW = H * W
    R = N * C

    # Style projection hoisted out of the kernel: one tiny batched XLA matmul.
    gb = (style.astype(jnp.float32) @ weight_t.astype(jnp.float32)
          + bias.astype(jnp.float32))                          # (N, 2C)
    gamma = gb[:, :C].reshape(R, 1)
    beta = gb[:, C:].reshape(R, 1)
    gb_rows = jnp.concatenate([gamma, beta], axis=1)           # (R, 2)

    x2 = x.reshape(R, HW)                                      # lane-dense rows

    block_r = _pick_block_rows(R, HW * x.dtype.itemsize)
    grid_r = R // block_r

    out = pl.pallas_call(
        adain_kernel,
        out_shape=jax.ShapeDtypeStruct((R, HW), x.dtype),
        grid_spec=pltpu.PrefetchScalarGridSpec(
            num_scalar_prefetch=0,
            grid=(grid_r,),
            in_specs=[
                pl.BlockSpec((block_r, 2), lambda r: (r, 0)),      # gamma|beta
                pl.BlockSpec((block_r, HW), lambda r: (r, 0)),     # x rows
            ],
            out_specs=pl.BlockSpec((block_r, HW), lambda r: (r, 0)),
        ),
        compiler_params=pltpu.CompilerParams(
            # Rows (= instances) are independent -> let v7x's 2 TensorCores
            # split the row-block loop; neutral on single-TC v5e/v6e.
            dimension_semantics=("parallel",),
            vmem_limit_bytes=_VMEM_LIMIT_BYTES,
        ),
    )(gb_rows, x2)
    return out.reshape(N, C, H, W)


def reference_adain(x, style, weight_t, bias):
    gb = style @ weight_t + bias                    # (N, 2C)
    C = x.shape[1]
    gamma = gb[:, :C][:, :, None, None]
    beta = gb[:, C:][:, :, None, None]
    mean = jnp.mean(x, axis=(2, 3), keepdims=True)
    var = jnp.mean((x - mean) ** 2, axis=(2, 3), keepdims=True)
    xhat = (x - mean) / jnp.sqrt(var + EPS)
    return gamma * xhat + beta


if __name__ == "__main__":
    # Small shapes consistent with the module: fin=4 channels, style_dim=32.
    N, C, H, W = 2, 4, 16, 16
    S = 32  # style_dim

    key = jax.random.PRNGKey(0)
    kx, ks, kw = jax.random.split(key, 3)

    x = jax.random.normal(kx, (N, C, H, W), dtype=jnp.float32)
    style = jax.random.normal(ks, (N, S), dtype=jnp.float32)

    # Deterministic parameter init for nn.Linear(style_dim, 2*fin):
    #   weight: (2C, S) -> stored transposed as (S, 2C) for the matmul.
    #   bias:   first C entries = 1 (gamma), last C entries = 0 (beta),
    #           exactly as in the module's __init__.
    bound = 1.0 / jnp.sqrt(S)
    weight = jax.random.uniform(kw, (2 * C, S), dtype=jnp.float32,
                                minval=-bound, maxval=bound)
    weight_t = weight.T
    bias = jnp.concatenate([jnp.ones((C,), jnp.float32),
                            jnp.zeros((C,), jnp.float32)])

    out = adaptive_instance_norm(x, style, weight_t, bias)
    out = jax.block_until_ready(out)

    ref = reference_adain(x, style, weight_t, bias)
    assert out.shape == (N, C, H, W)
    assert jnp.allclose(out, ref, rtol=1e-5, atol=1e-5), "mismatch vs reference"

    print("KERNEL_OK")
</pallas_src>

<mosaic_0001>
module attributes {stable_mosaic.version = 11 : i64} {
  func.func @adain_kernel(%arg0: i32, %arg1: memref<8x2xf32, #tpu.memory_space<vmem>>, %arg2: memref<8x256xf32, #tpu.memory_space<vmem>>, %arg3: memref<8x256xf32, #tpu.memory_space<vmem>>) attributes {dimension_semantics = [#tpu.dimension_semantics<parallel>], iteration_bounds = array<i64: 1>, scalar_prefetch = 0 : i64, scratch_operands = 0 : i64, tpu.core_type = #tpu.core_type<tc>, window_params = [{transform_indices = @transform_0, window_bounds = array<i64: 8, 2>}, {transform_indices = @transform_1, window_bounds = array<i64: 8, 256>}, {transform_indices = @transform_2, window_bounds = array<i64: 8, 256>}]} {
    %c0 = arith.constant 0 : index
    %c0_0 = arith.constant 0 : index
    %0 = vector.load %arg2[%c0, %c0_0] : memref<8x256xf32, #tpu.memory_space<vmem>>, vector<8x256xf32>
    %cst = arith.constant dense<0.000000e+00> : vector<8xf32>
    %1 = vector.multi_reduction <add>, %0, %cst [1] : vector<8x256xf32> to vector<8xf32>
    %2 = vector.shape_cast %1 : vector<8xf32> to vector<8x1xf32>
    %cst_1 = arith.constant 2.560000e+02 : f32
    %3 = vector.broadcast %cst_1 : f32 to vector<8x1xf32>
    %4 = arith.divf %2, %3 : vector<8x1xf32>
    %5 = vector.broadcast %4 : vector<8x1xf32> to vector<8x256xf32>
    %6 = arith.subf %0, %5 : vector<8x256xf32>
    %7 = arith.mulf %6, %6 : vector<8x256xf32>
    %cst_2 = arith.constant dense<0.000000e+00> : vector<8xf32>
    %8 = vector.multi_reduction <add>, %7, %cst_2 [1] : vector<8x256xf32> to vector<8xf32>
    %9 = vector.shape_cast %8 : vector<8xf32> to vector<8x1xf32>
    %cst_3 = arith.constant 2.560000e+02 : f32
    %10 = vector.broadcast %cst_3 : f32 to vector<8x1xf32>
    %11 = arith.divf %9, %10 : vector<8x1xf32>
    %c0_4 = arith.constant 0 : index
    %c0_5 = arith.constant 0 : index
    %12 = vector.load %arg1[%c0_4, %c0_5] : memref<8x2xf32, #tpu.memory_space<vmem>>, vector<8x1xf32>
    %c0_6 = arith.constant 0 : index
    %c1 = arith.constant 1 : index
    %13 = vector.load %arg1[%c0_6, %c1] : memref<8x2xf32, #tpu.memory_space<vmem>>, vector<8x1xf32>
    %cst_7 = arith.constant 9.99999974E-6 : f32
    %14 = vector.broadcast %cst_7 : f32 to vector<8x1xf32>
    %15 = arith.addf %11, %14 : vector<8x1xf32>
    %16 = math.rsqrt %15 : vector<8x1xf32>
    %17 = arith.mulf %12, %16 : vector<8x1xf32>
    %18 = arith.mulf %4, %17 : vector<8x1xf32>
    %19 = arith.subf %13, %18 : vector<8x1xf32>
    %20 = vector.broadcast %17 : vector<8x1xf32> to vector<8x256xf32>
    %21 = arith.mulf %0, %20 : vector<8x256xf32>
    %22 = vector.broadcast %19 : vector<8x1xf32> to vector<8x256xf32>
    %23 = arith.addf %21, %22 : vector<8x256xf32>
    %c0_8 = arith.constant 0 : index
    %c0_9 = arith.constant 0 : index
    %24 = vector.load %arg3[%c0_8, %c0_9] : memref<8x256xf32, #tpu.memory_space<vmem>>, vector<8x256xf32>
    tpu.vector_store %arg3[%c0_8, %c0_9], %23 {strides = array<i32>} : memref<8x256xf32, #tpu.memory_space<vmem>>, vector<8x256xf32>,
    return
  }
  func.func @transform_0(%arg0: i32) -> (i32, i32) {
    %c0_i32 = arith.constant 0 : i32
    %c0_i32_0 = arith.constant 0 : i32
    return %arg0, %c0_i32 : i32, i32
  }
  func.func @transform_1(%arg0: i32) -> (i32, i32) {
    %c0_i32 = arith.constant 0 : i32
    %c0_i32_0 = arith.constant 0 : i32
    return %arg0, %c0_i32 : i32, i32
  }
  func.func @transform_2(%arg0: i32) -> (i32, i32) {
    %c0_i32 = arith.constant 0 : i32
    %c0_i32_0 = arith.constant 0 : i32
    return %arg0, %c0_i32 : i32, i32
  }
}

</mosaic_0001>

<bundles_post_ra>
// kernel: tpu_custom_call.1
= control target key start
LH: loop header
LB: loop body
LE: loop exit
PB: predicated region body
PF: predicated region fallthrough
CT: control target
= control target key end

     0   :  { %7 = vsyncpa [#allocation3], 0  ;;  %s194_s0 = inlined_call_operand.vmem [shape: f32[8,2], index: 0, kind: input, shape index: {}]   ;;  %s195_s1 = inlined_call_operand.hbm [shape: f32[8,256], index: 1, kind: input, shape index: {}]   ;;  %s196_s2 = inlined_call_operand.hbm [shape: f32[8,256], index: 2, kind: output, shape index: {}]  }
   0x1   :  { %8 = vsyncpa [#allocation4], 0  ;;  %s16_s11 = sshll.u32 %s195_s1, 4  ;;  %s164_s12 = smov [#allocation2]   ;;  %s17_s11 = int_to_ptr.hbm [resolvable:$true] %s16_s11 }
   0x2   :  { %s18_s13 = sshll.u32 %s164_s12, 4  ;;  %s19_s13 = int_to_ptr.vmem [resolvable:$true] %s18_s13 }
   0x3   :  { %21 = dma.hbm_to_vmem [thread:$0]  %s17_s11, 256, %s19_s13, [#allocation3]  }
   0x4   :  { %160 = dma.done.wait [#allocation3], 256  }
   0x5   :  { %161 = vsyncadd [#allocation3], 4294967040  ;;  %v26_v0 = vld [vmem:[#allocation2] sm:$0xff]  ;;  %v27_v1 = vld [vmem:[#allocation2 + $0x8] sm:$0xff]  ;;  %v165_v3 = vmov 256.0   ;;  %v166_v17 = vmov 0  }
   0x6   :  { %v28_v2 = vadd.f32 %v27_v1, %v26_v0  ;;  %108 = vrcp.f32 %v165_v3  ;;  %105 = vset.pattern.permute.xlu1 %v166_v17  ;;  %v47_v26 = vld [vmem:[%s194_s0] sm:$0xff]  ;;  %s167_s15 = smov 1   ;;  %v168_v31 = vmov 1   ;;  %s169_s16 = smov [#allocation5]  }
   0x7   :  { %106 = vset.pattern.permute.xlu2 %v168_v31  ;;  %107 = vset.pattern.permute.xlu0 %v168_v31  ;;  %s87_s17 = sshll.u32 %s169_s16, 4  ;;  %s89_s19 = sshll.u32 %s196_s2, 4  ;;  %s88_s17 = int_to_ptr.vmem [resolvable:$true] %s87_s17  ;;  %s90_s19 = int_to_ptr.hbm [resolvable:$true] %s89_s19 }
   0x8   :  { %29 = vadd.xlane.f32.xlu0 %v28_v2 }
   0xc   :  { %v109_v4 = vpop.eup %108 }
   0xd   :  { %v32_v5 = vmul.f32 256.0, %v109_v4  ;;  %vm36_vm0 = vweird.f32 %v109_v4 }
   0xf   :  { %v33_v6 = vsub.f32 1.0, %v32_v5 }
  0x11   :  { %v34_v7 = vmul.f32 %v109_v4, %v33_v6 }
  0x13   :  { %v35_v8 = vadd.f32 %v109_v4, %v34_v7 }
  0x15   :  { %v37_v9 = vsel %vm36_vm0, %v109_v4, %v35_v8 }
  0x7b   :  { %v30_v10 = vpop.xlane.xlu0 %29 }
  0x7c   :  { %v38_v11 = vmul.f32 %v37_v9, %v30_v10 }
  0x7e   :  { %v39_v12 = vsub.f32 %v26_v0, %v38_v11  ;;  %v40_v13 = vsub.f32 %v27_v1, %v38_v11 }
  0x80   :  { %v41_v14 = vmul.f32 %v39_v12, %v39_v12  ;;  %v42_v15 = vmul.f32 %v40_v13, %v40_v13 }
  0x82   :  { %v43_v16 = vadd.f32 %v42_v15, %v41_v14 }
  0x84   :  { %44 = vadd.xlane.f32.xlu0 %v43_v16 }
  0xf7   :  { %v45_v18 = vpop.xlane.xlu0 %44 }
  0xf8   :  { %v46_v19 = vmul.f32 %v45_v18, %v37_v9 }
  0xfa   :  { %v48_v20 = vadd.f32 1e-05, %v46_v19 }
  0xfc   :  { %110 = vrsqrt.f32 %v48_v20  ;;  %vm55_vm2 = vweird.f32 %v48_v20 }
 0x102   :  { %v111_v21 = vpop.eup %110 }
 0x103   :  { %v50_v22 = vmul.f32 %v111_v21, %v48_v20  ;;  %vm56_vm1 = vweird.f32 %v111_v21 }
 0x104   :  { %vm57_vm3 = vmor %vm55_vm2, %vm56_vm1 }
 0x105   :  { %v51_v23 = vmul.f32 %v111_v21, %v50_v22 }
 0x107   :  { %v52_v24 = vmul.f32 0.5, %v51_v23 }
 0x109   :  { %v53_v25 = vsub.f32 1.5, %v52_v24 }
 0x10b   :  { %v54_v27 = vmul.f32 %v111_v21, %v53_v25 }
 0x10d   :  { %v58_v28 = vsel %vm57_vm3, %v111_v21, %v54_v27 }
 0x10e   :  { %v59_v29 = vmul.f32 %v58_v28, %v47_v26 }
 0x110   :  { %v60_v30 = vmul.f32 %v59_v29, %v38_v11 }
 0x112   :  { %62 = vrot.lane.b32.xlu1 %v60_v30, %s167_s15 }
 0x11a   :  { %68 = vperm.xlu1 %105, %v59_v29  }
 0x184   :  { %v63_v32 = vpop.permute.xlu1 %62 }
 0x185   :  { %v65_v33 = vsub.f32 %v47_v26, %v63_v32 }
 0x187   :  { %75 = vperm.xlu2 %106, %v65_v33  }
 0x18c   :  { %v69_v34 = vpop.permute.xlu1 %68 }
 0x18d   :  { %v71_v35 = vmul.f32 %v69_v34, %v26_v0  ;;  %v72_v36 = vmul.f32 %v69_v34, %v27_v1 }
 0x1e1   :  { %v76_v37 = vpop.permute.xlu2 %75 }
 0x1e2   :  { %v78_v38 = vadd.f32 %v76_v37, %v71_v35  ;;  %v79_v39 = vadd.f32 %v76_v37, %v72_v36 }
 0x1e4   :  { %80 = vst [vmem:[#allocation5] sm:$0xff] %v78_v38 }
 0x1e5   :  { %81 = vst [vmem:[#allocation5 + $0x8] sm:$0xff] %v79_v39 }
 0x1e6   :  { %92 = dma.vmem_to_hbm [thread:$0]  %s88_s17, 256, %s90_s19, [#allocation4]  }
 0x1e7   :  { %162 = dma.done.wait [#allocation4], 256  }
 0x1e8   :  { %163 = vsyncadd [#allocation4], 4294967040 }
 0x1e9   :  { %97 = vsyncpa [#allocation3], 1 }
 0x1ea   :  { %98 = vsyncpa [#allocation4], 1 }

</bundles_post_ra>
